<compile_context>
chip_gen: v7x
topology: tpu7x:2x2x1
jax: 0.10.0
libtpu: 0.0.40
codegen_flags: <defaults>
</compile_context>

<pallas_src>
import functools

import jax
import jax.numpy as jnp
from jax.experimental import pallas as pl
from jax.experimental.pallas import tpu as pltpu


def _round_up(x, m):
    return ((x + m - 1) // m) * m


# ---------------------------------------------------------------------------
# Kernel: one (bm) batch tile x one K-chunk (ci columns of x1 -> ci*IN2 rows of Wb)
# ---------------------------------------------------------------------------
def bilinear2_kernel(x1_ref, x2_ref, wb_ref, b1_ref, wl_ref, bl_ref, o_ref,
                     acc_ref, *, ci, precision):
    k = pl.program_id(1)
    f32 = jnp.float32

    @pl.when(k == 0)
    def _init():
        acc_ref[...] = jnp.zeros_like(acc_ref)

    # Flattened outer product for this chunk, built entirely on the VPU/XLU:
    #   z[b, t*IN2 + j] = x1_chunk[b, t] * x2[b, j]
    # (per-column broadcast-multiply + lane concat).  No MXU expansion matmuls,
    # no (bm, IN1, IN2) intermediate, no cross-lane reshape.
    x1v = x1_ref[...]                                   # (bm, ci)
    x2v = x2_ref[...]                                   # (bm, IN2)
    pieces = [x1v[:, t:t + 1] * x2v for t in range(ci)]
    z = pieces[0] if ci == 1 else jnp.concatenate(pieces, axis=-1)  # (bm, ci*IN2)

    # Bilinear contraction for this chunk (MXU, f32 accumulation).
    acc_ref[...] += jnp.dot(z.astype(wb_ref.dtype), wb_ref[...],
                            preferred_element_type=f32, precision=precision)

    @pl.when(k == pl.num_programs(1) - 1)
    def _finalize():
        h = jnp.maximum(acc_ref[...] + b1_ref[...], 0.0)            # bias + ReLU (f32, VPU)
        o = jnp.dot(h.astype(wl_ref.dtype), wl_ref[...],
                    preferred_element_type=f32, precision=precision) + bl_ref[...]
        o_ref[...] = o.astype(o_ref.dtype)


# ---------------------------------------------------------------------------
# One-time parameter preprocessing (hoisted out of the per-call path)
# ---------------------------------------------------------------------------
def prepare_bilinear2_params(w_bil, b_bil, w_lin, b_lin, *, mxu_dtype=jnp.float32):
    """w_bil:(NINT,IN1,IN2), b_bil:(NINT,), w_lin:(OUT,NINT), b_lin:(OUT,).

    mxu_dtype: dtype of the matmul operands. float32 = exact path; bfloat16 =
    throughput path (recommended on v5e/v6e/v7x; accumulation stays f32).
    """
    nint, in1, in2 = w_bil.shape
    out = w_lin.shape[0]

    kf = in1 * in2
    nint_p = _round_up(nint, 128)   # hidden lane dim (lane-dense matmul N)
    out_p = _round_up(out, 128)     # output lane dim (unmasked vst writeback)

    # Bilinear weight: (NINT, IN1, IN2) -> (IN1*IN2, NINT), lane-padded columns.
    wb = jnp.transpose(w_bil.reshape(nint, kf))                       # (kf, nint)
    wb = jnp.pad(wb, ((0, 0), (0, nint_p - nint))).astype(mxu_dtype)
    b1 = jnp.pad(b_bil, (0, nint_p - nint)).reshape(1, nint_p).astype(jnp.float32)

    # Linear weight: (OUT, NINT) -> (NINT, OUT), lane-padded.
    wl = jnp.pad(jnp.transpose(w_lin),
                 ((0, nint_p - nint), (0, out_p - out))).astype(mxu_dtype)
    bl = jnp.pad(b_lin, (0, out_p - out)).reshape(1, out_p).astype(jnp.float32)

    x_dtype = (jnp.bfloat16 if jnp.dtype(mxu_dtype) == jnp.dtype(jnp.bfloat16)
               else jnp.float32)
    return {
        "wb": wb, "b1": b1, "wl": wl, "bl": bl,
        "dims": (in1, in2, kf, nint_p, out_p, out),
        "x_dtype": x_dtype, "mxu_dtype": jnp.dtype(mxu_dtype),
    }


def _pick_num_chunks(in1, in2, max_chunk_kf):
    """Split the IN1 axis into gi chunks so each Wb slab / z chunk stays small.
    Requires in1 % gi == 0 and (in1//gi)*in2 % 8 == 0 (sublane rule for the
    Wb row blocks); falls back to gi=1 (no chunking) otherwise."""
    if in1 * in2 <= max_chunk_kf:
        return 1
    best = 1
    for g in range(2, in1 + 1):
        if in1 % g:
            continue
        ci = in1 // g
        if (ci * in2) % 8:
            continue
        best = g
        if ci * in2 <= max_chunk_kf:
            break
    return best


# ---------------------------------------------------------------------------
# Forward
# ---------------------------------------------------------------------------
def bilinear2_apply(params, x1, x2, *, bm=None, out_dtype=None, precision=None,
                    max_chunk_kf=2048):
    """x1:(B,IN1), x2:(B,IN2) -> (B,OUT)."""
    in1, in2, kf, nint_p, out_p, out = params["dims"]
    wb, b1, wl, bl = params["wb"], params["b1"], params["wl"], params["bl"]
    x_dtype = params["x_dtype"]
    if out_dtype is None:
        out_dtype = x_dtype            # bf16 path -> bf16 writeback (half HBM traffic)

    B = x1.shape[0]
    x1 = x1.astype(x_dtype)            # bf16 path: inputs stay bf16 end-to-end
    x2 = x2.astype(x_dtype)

    # --- batch tile --------------------------------------------------------
    sub = 16 if jnp.dtype(x_dtype).itemsize < 4 else 8   # bf16 packs 16 sublanes
    if bm is None:
        # ~B/2 so grid_m >= 2 ("parallel" steps feed both v7x TensorCores),
        # capped at 256 which amortizes per-step overhead on v5e/v6e.
        bm = min(256, _round_up(max(1, pl.cdiv(B, 2)), sub))
    bm = max(sub, min(_round_up(bm, sub), _round_up(B, sub)))
    grid_m = pl.cdiv(B, bm)
    b_pad = grid_m * bm
    if b_pad != B:
        x1 = jnp.pad(x1, ((0, b_pad - B), (0, 0)))
        x2 = jnp.pad(x2, ((0, b_pad - B), (0, 0)))

    # --- K (= IN1*IN2) chunking over the IN1 axis ---------------------------
    gi = _pick_num_chunks(in1, in2, max_chunk_kf)
    ci = in1 // gi
    ckf = ci * in2

    if gi == 1:
        x1_arg = x1                                                   # (b_pad, in1)
        x1_spec = pl.BlockSpec((bm, in1), lambda m, k: (m, 0))
        # Wb constant across the grid -> resident, single-buffered.
        wb_spec = pl.BlockSpec((kf, nint_p), lambda m, k: (0, 0),
                               pipeline_mode=pl.Buffered(1))
    else:
        # (b_pad, in1) -> (gi, b_pad, ci): grid step k streams one slab.
        x1_arg = jnp.transpose(x1.reshape(b_pad, gi, ci), (1, 0, 2))
        x1_spec = pl.BlockSpec((None, bm, ci), lambda m, k: (k, m, 0))
        wb_spec = pl.BlockSpec((ckf, nint_p), lambda m, k: (k, 0))    # double-buffered stream

    resident = dict(pipeline_mode=pl.Buffered(1))      # constant index_map -> 1 buffer
    in_specs = [
        x1_spec,
        pl.BlockSpec((bm, in2), lambda m, k: (m, 0)),                     # x2 tile
        wb_spec,                                                          # Wb slab
        pl.BlockSpec((1, nint_p), lambda m, k: (0, 0), **resident),       # b1
        pl.BlockSpec((nint_p, out_p), lambda m, k: (0, 0), **resident),   # Wl
        pl.BlockSpec((1, out_p), lambda m, k: (0, 0), **resident),        # bl
    ]
    out_spec = pl.BlockSpec((bm, out_p), lambda m, k: (m, 0))

    # --- VMEM budget derived from the actual buffers (not hardcoded) --------
    xsz = jnp.dtype(x_dtype).itemsize
    wsz = params["mxu_dtype"].itemsize
    osz = jnp.dtype(out_dtype).itemsize
    buf_bytes = (
        2 * bm * ci * xsz                               # x1 blocks (double-buffered)
        + 2 * bm * in2 * xsz                            # x2 blocks
        + (2 if gi > 1 else 1) * ckf * nint_p * wsz     # Wb slab(s)
        + nint_p * out_p * wsz                          # Wl (single buffer)
        + (nint_p + out_p) * 4                          # biases
        + 2 * bm * out_p * osz                          # out blocks
        + bm * nint_p * 4                               # f32 accumulator scratch
        + 2 * bm * ckf * 4 + 3 * bm * nint_p * 4        # in-kernel temporaries (z, y/h)
    )
    # Small problems stay far below v7x's 64 MiB; big ones get what they need.
    vmem_limit = min(int(buf_bytes) + (8 << 20), 100 << 20)

    flops = 2 * b_pad * (kf * nint_p + nint_p * out_p) + b_pad * kf
    bytes_accessed = int(
        x1.size * xsz + x2.size * xsz + wb.size * wsz + wl.size * wsz
        + (b1.size + bl.size) * 4 + b_pad * out_p * osz)

    kernel = functools.partial(bilinear2_kernel, ci=ci, precision=precision)

    res = pl.pallas_call(
        kernel,
        out_shape=jax.ShapeDtypeStruct((b_pad, out_p), out_dtype),
        grid_spec=pltpu.PrefetchScalarGridSpec(
            num_scalar_prefetch=0,
            grid=(grid_m, gi),
            in_specs=in_specs,
            out_specs=out_spec,
            scratch_shapes=[pltpu.VMEM((bm, nint_p), jnp.float32)],
        ),
        compiler_params=pltpu.CompilerParams(
            dimension_semantics=("parallel", "arbitrary"),
            vmem_limit_bytes=vmem_limit,
        ),
        cost_estimate=pl.CostEstimate(
            flops=flops, transcendentals=0, bytes_accessed=bytes_accessed),
    )(x1_arg, x2, wb, b1, wl, bl)

    return res[:B, :out]


def bilinear2_forward(x1, x2, w_bil, b_bil, w_lin, b_lin, *, mxu_dtype=jnp.float32,
                      **apply_kwargs):
    """One-shot convenience wrapper (prefer prepare + apply for repeated calls)."""
    params = prepare_bilinear2_params(w_bil, b_bil, w_lin, b_lin, mxu_dtype=mxu_dtype)
    return bilinear2_apply(params, x1, x2, **apply_kwargs)


# ---------------------------------------------------------------------------
# Reference + self-test
# ---------------------------------------------------------------------------
def _reference(x1, x2, w_bil, b_bil, w_lin, b_lin):
    y = jnp.einsum('bi,kij,bj->bk', x1, w_bil, x2) + b_bil[None, :]
    return jnp.maximum(y, 0.0) @ w_lin.T + b_lin[None, :]


def _make_inputs(key, B, IN1, IN2, NINT, OUT):
    k1, k2, k3, k4, k5, k6 = jax.random.split(key, 6)
    x1 = jax.random.normal(k1, (B, IN1), jnp.float32)
    x2 = jax.random.normal(k2, (B, IN2), jnp.float32)
    bb = 1.0 / (IN1 ** 0.5)
    w_bil = jax.random.uniform(k3, (NINT, IN1, IN2), jnp.float32, -bb, bb)
    b_bil = jax.random.uniform(k4, (NINT,), jnp.float32, -bb, bb)
    bl_ = 1.0 / (NINT ** 0.5)
    w_lin = jax.random.uniform(k5, (OUT, NINT), jnp.float32, -bl_, bl_)
    b_lin = jax.random.uniform(k6, (OUT,), jnp.float32, -bl_, bl_)
    return x1, x2, w_bil, b_bil, w_lin, b_lin


if __name__ == "__main__":
    key = jax.random.PRNGKey(0)
    kA, kB = jax.random.split(key)

    # Small shapes consistent with Bilinear2(in1, in2, nint, out).
    B, IN1, IN2, NINT, OUT = 16, 16, 32, 64, 8
    x1, x2, w_bil, b_bil, w_lin, b_lin = _make_inputs(kA, B, IN1, IN2, NINT, OUT)
    ref = _reference(x1, x2, w_bil, b_bil, w_lin, b_lin)

    # Exact f32 path (params prepared once, reused per call).
    p32 = prepare_bilinear2_params(w_bil, b_bil, w_lin, b_lin, mxu_dtype=jnp.float32)
    o32 = jax.block_until_ready(bilinear2_apply(p32, x1, x2))
    assert o32.shape == (B, OUT)
    assert jnp.allclose(o32, ref, atol=1e-4, rtol=1e-4), "f32 path mismatch"

    # bf16 MXU-operand / f32-accumulate throughput path (bf16 in/out).
    p16 = prepare_bilinear2_params(w_bil, b_bil, w_lin, b_lin, mxu_dtype=jnp.bfloat16)
    o16 = jax.block_until_ready(bilinear2_apply(p16, x1, x2))
    assert o16.shape == (B, OUT)
    assert jnp.allclose(o16.astype(jnp.float32), ref, atol=5e-2, rtol=5e-2), \
        "bf16 path mismatch"

    # Larger IN1*IN2 to exercise the K-chunked (streamed Wb slabs) path.
    B2, IN1b, IN2b, NINTb, OUTb = 24, 48, 48, 96, 10
    xx1, xx2, wb2, bb2, wl2, bl2 = _make_inputs(kB, B2, IN1b, IN2b, NINTb, OUTb)
    ref2 = _reference(xx1, xx2, wb2, bb2, wl2, bl2)
    p32b = prepare_bilinear2_params(wb2, bb2, wl2, bl2, mxu_dtype=jnp.float32)
    o2 = jax.block_until_ready(bilinear2_apply(p32b, xx1, xx2, max_chunk_kf=1024))
    assert o2.shape == (B2, OUTb)
    assert jnp.allclose(o2, ref2, atol=1e-3, rtol=1e-3), "chunked f32 path mismatch"

    print("KERNEL_OK")
</pallas_src>

<mosaic_0001>
module attributes {stable_mosaic.version = 11 : i64} {
  func.func @bilinear2_kernel(%arg0: i32, %arg1: i32, %arg2: memref<8x16xf32, #tpu.memory_space<vmem>>, %arg3: memref<8x32xf32, #tpu.memory_space<vmem>>, %arg4: memref<512x128xf32, #tpu.memory_space<vmem>>, %arg5: memref<1x128xf32, #tpu.memory_space<vmem>>, %arg6: memref<128x128xf32, #tpu.memory_space<vmem>>, %arg7: memref<1x128xf32, #tpu.memory_space<vmem>>, %arg8: memref<8x128xf32, #tpu.memory_space<vmem>>, %arg9: memref<8x128xf32, #tpu.memory_space<vmem>>) attributes {dimension_semantics = [#tpu.dimension_semantics<parallel>, #tpu.dimension_semantics<arbitrary>], iteration_bounds = array<i64: 2, 1>, scalar_prefetch = 0 : i64, scratch_operands = 1 : i64, tpu.core_type = #tpu.core_type<tc>, window_params = [{transform_indices = @transform_0, window_bounds = array<i64: 8, 16>}, {transform_indices = @transform_1, window_bounds = array<i64: 8, 32>}, {pipeline_mode = #tpu.pipeline_mode<synchronous>, transform_indices = @transform_2, window_bounds = array<i64: 512, 128>}, {pipeline_mode = #tpu.pipeline_mode<synchronous>, transform_indices = @transform_3, window_bounds = array<i64: 1, 128>}, {pipeline_mode = #tpu.pipeline_mode<synchronous>, transform_indices = @transform_4, window_bounds = array<i64: 128, 128>}, {pipeline_mode = #tpu.pipeline_mode<synchronous>, transform_indices = @transform_5, window_bounds = array<i64: 1, 128>}, {transform_indices = @transform_6, window_bounds = array<i64: 8, 128>}]} {
    %c0_i32 = arith.constant 0 : i32
    %0 = arith.cmpi eq, %arg1, %c0_i32 : i32
    %1 = arith.extui %0 : i1 to i32
    %c0_i32_0 = arith.constant 0 : i32
    %2 = arith.cmpi ne, %1, %c0_i32_0 : i32
    scf.if %2 {
      %cst_12 = arith.constant 0.000000e+00 : f32
      %62 = vector.broadcast %cst_12 : f32 to vector<8x128xf32>
      %c0_13 = arith.constant 0 : index
      %c0_14 = arith.constant 0 : index
      %63 = vector.load %arg9[%c0_13, %c0_14] : memref<8x128xf32, #tpu.memory_space<vmem>>, vector<8x128xf32>
      tpu.vector_store %arg9[%c0_13, %c0_14], %62 {strides = array<i32>} : memref<8x128xf32, #tpu.memory_space<vmem>>, vector<8x128xf32>,
    } else {
    }
    %c0 = arith.constant 0 : index
    %c0_1 = arith.constant 0 : index
    %3 = vector.load %arg2[%c0, %c0_1] : memref<8x16xf32, #tpu.memory_space<vmem>>, vector<8x16xf32>
    %c0_2 = arith.constant 0 : index
    %c0_3 = arith.constant 0 : index
    %4 = vector.load %arg3[%c0_2, %c0_3] : memref<8x32xf32, #tpu.memory_space<vmem>>, vector<8x32xf32>
    %5 = vector.extract_strided_slice %3 {offsets = [0, 0], sizes = [8, 1], strides = [1, 1]} : vector<8x16xf32> to vector<8x1xf32>
    %6 = vector.broadcast %5 : vector<8x1xf32> to vector<8x32xf32>
    %7 = arith.mulf %6, %4 : vector<8x32xf32>
    %8 = vector.extract_strided_slice %3 {offsets = [0, 1], sizes = [8, 1], strides = [1, 1]} : vector<8x16xf32> to vector<8x1xf32>
    %9 = vector.broadcast %8 : vector<8x1xf32> to vector<8x32xf32>
    %10 = arith.mulf %9, %4 : vector<8x32xf32>
    %11 = vector.extract_strided_slice %3 {offsets = [0, 2], sizes = [8, 1], strides = [1, 1]} : vector<8x16xf32> to vector<8x1xf32>
    %12 = vector.broadcast %11 : vector<8x1xf32> to vector<8x32xf32>
    %13 = arith.mulf %12, %4 : vector<8x32xf32>
    %14 = vector.extract_strided_slice %3 {offsets = [0, 3], sizes = [8, 1], strides = [1, 1]} : vector<8x16xf32> to vector<8x1xf32>
    %15 = vector.broadcast %14 : vector<8x1xf32> to vector<8x32xf32>
    %16 = arith.mulf %15, %4 : vector<8x32xf32>
    %17 = vector.extract_strided_slice %3 {offsets = [0, 4], sizes = [8, 1], strides = [1, 1]} : vector<8x16xf32> to vector<8x1xf32>
    %18 = vector.broadcast %17 : vector<8x1xf32> to vector<8x32xf32>
    %19 = arith.mulf %18, %4 : vector<8x32xf32>
    %20 = vector.extract_strided_slice %3 {offsets = [0, 5], sizes = [8, 1], strides = [1, 1]} : vector<8x16xf32> to vector<8x1xf32>
    %21 = vector.broadcast %20 : vector<8x1xf32> to vector<8x32xf32>
    %22 = arith.mulf %21, %4 : vector<8x32xf32>
    %23 = vector.extract_strided_slice %3 {offsets = [0, 6], sizes = [8, 1], strides = [1, 1]} : vector<8x16xf32> to vector<8x1xf32>
    %24 = vector.broadcast %23 : vector<8x1xf32> to vector<8x32xf32>
    %25 = arith.mulf %24, %4 : vector<8x32xf32>
    %26 = vector.extract_strided_slice %3 {offsets = [0, 7], sizes = [8, 1], strides = [1, 1]} : vector<8x16xf32> to vector<8x1xf32>
    %27 = vector.broadcast %26 : vector<8x1xf32> to vector<8x32xf32>
    %28 = arith.mulf %27, %4 : vector<8x32xf32>
    %29 = vector.extract_strided_slice %3 {offsets = [0, 8], sizes = [8, 1], strides = [1, 1]} : vector<8x16xf32> to vector<8x1xf32>
    %30 = vector.broadcast %29 : vector<8x1xf32> to vector<8x32xf32>
    %31 = arith.mulf %30, %4 : vector<8x32xf32>
    %32 = vector.extract_strided_slice %3 {offsets = [0, 9], sizes = [8, 1], strides = [1, 1]} : vector<8x16xf32> to vector<8x1xf32>
    %33 = vector.broadcast %32 : vector<8x1xf32> to vector<8x32xf32>
    %34 = arith.mulf %33, %4 : vector<8x32xf32>
    %35 = vector.extract_strided_slice %3 {offsets = [0, 10], sizes = [8, 1], strides = [1, 1]} : vector<8x16xf32> to vector<8x1xf32>
    %36 = vector.broadcast %35 : vector<8x1xf32> to vector<8x32xf32>
    %37 = arith.mulf %36, %4 : vector<8x32xf32>
    %38 = vector.extract_strided_slice %3 {offsets = [0, 11], sizes = [8, 1], strides = [1, 1]} : vector<8x16xf32> to vector<8x1xf32>
    %39 = vector.broadcast %38 : vector<8x1xf32> to vector<8x32xf32>
    %40 = arith.mulf %39, %4 : vector<8x32xf32>
    %41 = vector.extract_strided_slice %3 {offsets = [0, 12], sizes = [8, 1], strides = [1, 1]} : vector<8x16xf32> to vector<8x1xf32>
    %42 = vector.broadcast %41 : vector<8x1xf32> to vector<8x32xf32>
    %43 = arith.mulf %42, %4 : vector<8x32xf32>
    %44 = vector.extract_strided_slice %3 {offsets = [0, 13], sizes = [8, 1], strides = [1, 1]} : vector<8x16xf32> to vector<8x1xf32>
    %45 = vector.broadcast %44 : vector<8x1xf32> to vector<8x32xf32>
    %46 = arith.mulf %45, %4 : vector<8x32xf32>
    %47 = vector.extract_strided_slice %3 {offsets = [0, 14], sizes = [8, 1], strides = [1, 1]} : vector<8x16xf32> to vector<8x1xf32>
    %48 = vector.broadcast %47 : vector<8x1xf32> to vector<8x32xf32>
    %49 = arith.mulf %48, %4 : vector<8x32xf32>
    %50 = vector.extract_strided_slice %3 {offsets = [0, 15], sizes = [8, 1], strides = [1, 1]} : vector<8x16xf32> to vector<8x1xf32>
    %51 = vector.broadcast %50 : vector<8x1xf32> to vector<8x32xf32>
    %52 = arith.mulf %51, %4 : vector<8x32xf32>
    %53 = tpu.concatenate %7, %10, %13, %16, %19, %22, %25, %28, %31, %34, %37, %40, %43, %46, %49, %52 in 1 : vector<8x32xf32>, vector<8x32xf32>, vector<8x32xf32>, vector<8x32xf32>, vector<8x32xf32>, vector<8x32xf32>, vector<8x32xf32>, vector<8x32xf32>, vector<8x32xf32>, vector<8x32xf32>, vector<8x32xf32>, vector<8x32xf32>, vector<8x32xf32>, vector<8x32xf32>, vector<8x32xf32>, vector<8x32xf32> -> vector<8x512xf32>
    %c0_4 = arith.constant 0 : index
    %c0_5 = arith.constant 0 : index
    %54 = vector.load %arg9[%c0_4, %c0_5] : memref<8x128xf32, #tpu.memory_space<vmem>>, vector<8x128xf32>
    %c0_6 = arith.constant 0 : index
    %c0_7 = arith.constant 0 : index
    %55 = vector.load %arg4[%c0_6, %c0_7] : memref<512x128xf32, #tpu.memory_space<vmem>>, vector<512x128xf32>
    %cst = arith.constant dense<0.000000e+00> : vector<8x128xf32>
    %56 = tpu.matmul %53, %55, %cst {dimension_numbers = #tpu.dot_dimension_numbers<[1], [0], [0], [1], [0, 0, 1, 1], [], []>} : vector<8x512xf32>, vector<512x128xf32>, vector<8x128xf32> -> vector<8x128xf32>
    %57 = arith.addf %54, %56 : vector<8x128xf32>
    %c0_8 = arith.constant 0 : index
    %c0_9 = arith.constant 0 : index
    %58 = vector.load %arg9[%c0_8, %c0_9] : memref<8x128xf32, #tpu.memory_space<vmem>>, vector<8x128xf32>
    tpu.vector_store %arg9[%c0_8, %c0_9], %57 {strides = array<i32>} : memref<8x128xf32, #tpu.memory_space<vmem>>, vector<8x128xf32>,
    %c0_i32_10 = arith.constant 0 : i32
    %59 = arith.cmpi eq, %arg1, %c0_i32_10 : i32
    %60 = arith.extui %59 : i1 to i32
    %c0_i32_11 = arith.constant 0 : i32
    %61 = arith.cmpi ne, %60, %c0_i32_11 : i32
    scf.if %61 {
      %c0_12 = arith.constant 0 : index
      %c0_13 = arith.constant 0 : index
      %62 = vector.load %arg9[%c0_12, %c0_13] : memref<8x128xf32, #tpu.memory_space<vmem>>, vector<8x128xf32>
      %c0_14 = arith.constant 0 : index
      %c0_15 = arith.constant 0 : index
      %63 = vector.load %arg5[%c0_14, %c0_15] : memref<1x128xf32, #tpu.memory_space<vmem>>, vector<1x128xf32>
      %64 = vector.broadcast %63 : vector<1x128xf32> to vector<8x128xf32>
      %65 = arith.addf %62, %64 : vector<8x128xf32>
      %cst_16 = arith.constant 0.000000e+00 : f32
      %66 = vector.broadcast %cst_16 : f32 to vector<8x128xf32>
      %67 = arith.maximumf %65, %66 : vector<8x128xf32>
      %c0_17 = arith.constant 0 : index
      %c0_18 = arith.constant 0 : index
      %68 = vector.load %arg6[%c0_17, %c0_18] : memref<128x128xf32, #tpu.memory_space<vmem>>, vector<128x128xf32>
      %cst_19 = arith.constant dense<0.000000e+00> : vector<8x128xf32>
      %69 = tpu.matmul %67, %68, %cst_19 {dimension_numbers = #tpu.dot_dimension_numbers<[1], [0], [0], [1], [0, 0, 1, 1], [], []>} : vector<8x128xf32>, vector<128x128xf32>, vector<8x128xf32> -> vector<8x128xf32>
      %c0_20 = arith.constant 0 : index
      %c0_21 = arith.constant 0 : index
      %70 = vector.load %arg7[%c0_20, %c0_21] : memref<1x128xf32, #tpu.memory_space<vmem>>, vector<1x128xf32>
      %71 = vector.broadcast %70 : vector<1x128xf32> to vector<8x128xf32>
      %72 = arith.addf %69, %71 : vector<8x128xf32>
      %c0_22 = arith.constant 0 : index
      %c0_23 = arith.constant 0 : index
      %73 = vector.load %arg8[%c0_22, %c0_23] : memref<8x128xf32, #tpu.memory_space<vmem>>, vector<8x128xf32>
      tpu.vector_store %arg8[%c0_22, %c0_23], %72 {strides = array<i32>} : memref<8x128xf32, #tpu.memory_space<vmem>>, vector<8x128xf32>,
    } else {
    }
    return
  }
  func.func @transform_0(%arg0: i32, %arg1: i32) -> (i32, i32) {
    %c0_i32 = arith.constant 0 : i32
    %c0_i32_0 = arith.constant 0 : i32
    return %arg0, %c0_i32 : i32, i32
  }
  func.func @transform_1(%arg0: i32, %arg1: i32) -> (i32, i32) {
    %c0_i32 = arith.constant 0 : i32
    %c0_i32_0 = arith.constant 0 : i32
    return %arg0, %c0_i32 : i32, i32
  }
  func.func @transform_2(%arg0: i32, %arg1: i32) -> (i32, i32) {
    %c0_i32 = arith.constant 0 : i32
    %c0_i32_0 = arith.constant 0 : i32
    %c0_i32_1 = arith.constant 0 : i32
    return %c0_i32, %c0_i32_0 : i32, i32
  }
  func.func @transform_3(%arg0: i32, %arg1: i32) -> (i32, i32) {
    %c0_i32 = arith.constant 0 : i32
    %c0_i32_0 = arith.constant 0 : i32
    %c0_i32_1 = arith.constant 0 : i32
    return %c0_i32, %c0_i32_0 : i32, i32
  }
  func.func @transform_4(%arg0: i32, %arg1: i32) -> (i32, i32) {
    %c0_i32 = arith.constant 0 : i32
    %c0_i32_0 = arith.constant 0 : i32
    %c0_i32_1 = arith.constant 0 : i32
    return %c0_i32, %c0_i32_0 : i32, i32
  }
  func.func @transform_5(%arg0: i32, %arg1: i32) -> (i32, i32) {
    %c0_i32 = arith.constant 0 : i32
    %c0_i32_0 = arith.constant 0 : i32
    %c0_i32_1 = arith.constant 0 : i32
    return %c0_i32, %c0_i32_0 : i32, i32
  }
  func.func @transform_6(%arg0: i32, %arg1: i32) -> (i32, i32) {
    %c0_i32 = arith.constant 0 : i32
    %c0_i32_0 = arith.constant 0 : i32
    return %arg0, %c0_i32 : i32, i32
  }
}

</mosaic_0001>

<bundles_post_ra>
// kernel: tpu_custom_call.1
= control target key start
LH: loop header
LB: loop body
LE: loop exit
PB: predicated region body
PF: predicated region fallthrough
CT: control target
= control target key end

     0   :  { %s1946_s0 = inlined_call_operand.hbm [shape: f32[16,16], index: 0, kind: input, shape index: {}]   ;;  %s1947_s1 = inlined_call_operand.hbm [shape: f32[16,32], index: 1, kind: input, shape index: {}]   ;;  %s1948_s2 = inlined_call_operand.hbm [shape: f32[512,128], index: 2, kind: input, shape index: {}]   ;;  %s1949_s3 = inlined_call_operand.vmem [shape: f32[1,128], index: 3, kind: input, shape index: {}]   ;;  %s1950_s4 = inlined_call_operand.hbm [shape: f32[128,128], index: 4, kind: input, shape index: {}]   ;;  %s1951_s5 = inlined_call_operand.vmem [shape: f32[1,128], index: 5, kind: input, shape index: {}]   ;;  %s1952_s6 = inlined_call_operand.hbm [shape: f32[16,128], index: 6, kind: output, shape index: {}]  }
   0x1   :  { %1959 = sst [smem:[#allocation20_spill]] %s1948_s2 }
   0x2   :  { %1960 = sst [smem:[#allocation21_spill]] %s1950_s4 }
   0x3   :  { %11 = vsyncpa [#allocation4], 0 }
   0x4   :  { %13 = vsyncpa [#allocation4 + $0x1], 0 }
   0x5   :  { %14 = vsyncpa [#allocation7], 0 }
   0x6   :  { %16 = vsyncpa [#allocation7 + $0x1], 0 }
   0x7   :  { %17 = vsyncpa [#allocation10], 0 }
   0x8   :  { %18 = vsyncpa [#allocation5], 0 }
   0x9   :  { %20 = vsyncpa [#allocation5 + $0x1], 0  ;;  %s1611_s21 = smov 0   ;;  %s1613_s22 = smov 0  }
   0xa   :  { %s1615_s23 = smov 0   ;;  %s1617_s24 = smov 0  }
   0xb   :  { %s1619_s25 = smov 0   ;;  %s1621_s26 = smov 0  }
   0xc LB: > { %1961 = sst [smem:[#allocation17_spill]] %s1541_s25  ;;  %s1642_s27 = sadd.s32 4294967295, %s1545_s26   ;;  %s1545_s26 = sphi %s1621_s26, %s26_s26   ;;  %s1541_s25 = sphi %s1619_s25, %s1984_s25   ;;  %s1537_s24 = sphi %s1617_s24, %s1983_s24   ;;  %s1533_s23 = sphi %s1615_s23, %s1987_s23   ;;  %s1529_s22 = sphi %s1613_s22, %s1986_s22   ;;  %s1525_s21 = sphi %s1611_s21, %s1985_s21  }
   0xd   : > { %s945_s28 = sadd.s32 4294967294, %s1545_s26   ;;  %p58_p0 = scmp.ne.s32.totalorder %s1529_s22, %s1525_s21 }
   0xe   : > { %p1953_p1 = scmp.eq.s32.totalorder %s1642_s27, 0  ;;  %p198_p3 = scmp.eq.s32.totalorder %s945_s28, 1 }
   0xf   : > { %p946_p5 = scmp.ge.s32.totalorder %s1545_s26, 1  ;;  %p205_p7 = scmp.lt.s32.totalorder %s1545_s26, 3 }
  0x10   : > { %p1651_p4 = por %p1953_p1, %p58_p0  ;;  %p1656_p6 = por %p198_p3, %p58_p0 }
  0x11   : > { %p1661_p8 = pnand %p946_p5, %p205_p7  ;;  %s1547_s8 = smov [#allocation8]  }
  0x12   : > { %s1962_s29 = scalar_select %p1651_p4, 1, 0 }
  0x13   : > { %s1963_s30 = scalar_select %p1656_p6, 1, 0 }
  0x14   : > { %s1964_s7 = scalar_select %p1661_p8, 1, 0 }
  0x15   : > { %s217_s9 = sshll.u32 %s1547_s8, 4  ;;  %p1190_p9 = pneg %p1661_p8  ;;  %s1665_s9 = int_to_ptr.vmem [resolvable:$true] %s217_s9 }
  0x16   : > { %s1548_s11 = smov [#allocation9]   ;;  %s1966_s2 = sld [smem:[#allocation20_spill]] }
  0x17   : > { %p1672_p11 = pnand %p1190_p9, %p1953_p1  ;;  %s233_s12 = sshll.u32 %s1548_s11, 4  ;;  %s1676_s12 = int_to_ptr.vmem [resolvable:$true] %s233_s12 }
  0x19   : > { %p1337_p13 = pneg %p1672_p11 }
  0x1c   : > { %s1335_s15 = scalar_lea.hbm %s1966_s2, 8192 }
  0x1d   : > { %p1336_p12 = scmp.ne.s32.totalorder %s1966_s2, %s1335_s15  ;;  %p1342_p5 = scmp.lt.u32.totalorder %s1335_s15, %s1966_s2 }
  0x1f   : > { %p1338_p0 = pnand %p1337_p13, %p1336_p12 }
  0x21   : > { %p1339_p3 = pneg %p1338_p0 }
  0x23   : > { %p1344_p7 = pnand %p1342_p5, %p1339_p3 }
  0x25   : > { %1347 = shalt.err (!%p1344_p7)
}
  0x26   : > { %s1348_s20 = scalar_lea.vmem %s1665_s9, 8192  ;;  %p1356_p2 = scmp.lt.s32.totalorder %s1665_s9, %s1665_s9 }
  0x27   : > { %p1349_p9 = scmp.ne.s32.totalorder %s1665_s9, %s1348_s20  ;;  %p1357_p12 = scmp.lt.s32.totalorder %s1348_s20, %s1348_s20 }
  0x29   : > { %p1351_p10 = pnand %p1349_p9, %p1337_p13  ;;  %p1358_p0 = por %p1357_p12, %p1356_p2 }
  0x2b   : > { %p1352_p1 = pneg %p1351_p10 }
  0x2d   : > { %p1359_p6 = pnand %p1358_p0, %p1352_p1 }
  0x2f   : > { %1362 = shalt.err (!%p1359_p6)
}
  0x30   : > { %s1549_s28 = smov 128   ;;  %s1550_s8 = smov 8  }
  0x31   : > { %1193 = dma.hbm_to_vmem [thread:$0]  (!%p1672_p11), %s1966_s2, 8192, %s1665_s9, [#allocation7], %s1549_s28, %s1549_s28, %s1550_s8  }
  0x32   : > { %s1967_s4 = sld [smem:[#allocation21_spill]] }
  0x38   : > { %s1363_s16 = scalar_lea.hbm %s1967_s4, 2048 }
  0x39   : > { %p1364_p2 = scmp.ne.s32.totalorder %s1967_s4, %s1363_s16  ;;  %p1370_p10 = scmp.lt.u32.totalorder %s1363_s16, %s1967_s4 }
  0x3b   : > { %p1366_p1 = pnand %p1364_p2, %p1337_p13 }
  0x3d   : > { %p1367_p6 = pneg %p1366_p1 }
  0x3f   : > { %p1372_p3 = pnand %p1370_p10, %p1367_p6 }
  0x41   : > { %1375 = shalt.err (!%p1372_p3)
}
  0x42   : > { %s1376_s9 = scalar_lea.vmem %s1676_s12, 2048  ;;  %p1384_p12 = scmp.lt.s32.totalorder %s1676_s12, %s1676_s12 }
  0x43   : > { %p1377_p5 = scmp.ne.s32.totalorder %s1676_s12, %s1376_s9  ;;  %p1385_p0 = scmp.lt.s32.totalorder %s1376_s9, %s1376_s9 }
  0x45   : > { %p1379_p7 = pnand %p1377_p5, %p1337_p13  ;;  %p1386_p2 = por %p1385_p0, %p1384_p12 }
  0x47   : > { %p1380_p9 = pneg %p1379_p7 }
  0x49   : > { %p1387_p1 = pnand %p1386_p2, %p1380_p9 }
  0x4b   : > { %1390 = shalt.err (!%p1387_p1)
}
  0x4c   : > { %1196 = dma.hbm_to_vmem [thread:$0]  (!%p1672_p11), %s1967_s4, 2048, %s1676_s12, [#allocation10], %s1549_s28, %s1549_s28, %s1550_s8  }
  0x4d   : > { %s38_s14 = sadd.s32 1, %s1541_s25  ;;  %s45_s15 = sadd.s32 1, %s1533_s23 }
  0x4e   : > { %p40_p13 = scmp.ge.s32.totalorder %s38_s14, 2  ;;  %p52_p6 = scmp.ne.s32.totalorder %s1533_s23, %s1529_s22 }
  0x4f   : > { %p53_p10 = scmp.eq.s32.totalorder %s1545_s26, 0  ;;  %p1210_p3 = scmp.lt.s32.totalorder %s1545_s26, 2 }
  0x50   : > { %s1989_s14 = smov (%p40_p13, %s38_s14), 0  ;;  %p1969_p7 = scmp.eq.s32.totalorder %s1642_s27, 1 }
  0x51   : > { %1968 = sst [smem:[#allocation18_spill]] %s1989_s14  ;;  %p54_p5 = por %p53_p10, %p52_p6 }
  0x52   : > { %p1740_p9 = por %p1969_p7, %p52_p6  ;;  %s42_s16 = ssub.s32 %s1541_s25, %s1989_s14 }
  0x53   : > { %s250_s17 = sand.u32 1, %s1533_s23   ;;  %p43_p12 = scmp.eq.s32.totalorder %s42_s16, 0 }
  0x54   : > { %s1970_s10 = scalar_select %p1740_p9, 1, 0 }
  0x55   : > { %s1747_s12 = sshll.u32 %s250_s17, 3  ;;  %s951_s28 = sshll.u32 %s1541_s25, 7 }
  0x56   : > { %s1751_s8 = scalar_select %p43_p12, %s1533_s23, %s45_s15  }
  0x57   : > { %s1756_s20 = scalar_lea.hbm %s1946_s0, %s951_s28  ;;  %s254_s9 = scalar_lea.vmem [#allocation3], %s1747_s12 }
  0x58   : > { %1971 = sst [smem:[#allocation19_spill]] %s1751_s8  ;;  %s261_s11 = sshll.u32 %s254_s9, 4  ;;  %s1765_s11 = int_to_ptr.vmem [resolvable:$true] %s261_s11 }
  0x59   : > { %p1761_p11 = pnand %p1210_p3, %p54_p5  ;;  %s1770_s18 = scalar_lea.hbm %s1947_s1, %s951_s28 }
  0x5a   : > { %s251_s19 = scalar_lea.sflag [#allocation4], %s250_s17  ;;  %s1391_s2 = scalar_lea.hbm %s1756_s20, 128 }
  0x5b   : > { %p1392_p0 = scmp.ne.s32.totalorder %s1756_s20, %s1391_s2  ;;  %p1393_p2 = pneg %p1761_p11 }
  0x5c   : > { %s1396_s14 = scalar_lea.hbm %s1946_s0, 256  ;;  %p1397_p6 = scmp.lt.u32.totalorder %s1756_s20, %s1946_s0 }
  0x5d   : > { %p1394_p1 = pnand %p1393_p2, %p1392_p0  ;;  %p1398_p10 = scmp.lt.u32.totalorder %s1396_s14, %s1391_s2 }
  0x5e   : > { %p1400_p5 = scmp.lt.u32.totalorder %s1391_s2, %s1756_s20 }
  0x5f   : > { %p1395_p13 = pneg %p1394_p1  ;;  %p1399_p3 = por %p1398_p10, %p1397_p6 }
  0x61   : > { %p1401_p7 = por %p1400_p5, %p1399_p3 }
  0x63   : > { %p1402_p12 = pnand %p1401_p7, %p1395_p13 }
  0x65   : > { %1405 = shalt.err (!%p1402_p12)
}
  0x66   : > { %s1406_s17 = scalar_lea.vmem %s1765_s11, 128  ;;  %s1551_s4 = smov [#allocation3]  }
  0x67   : > { %p1407_p0 = scmp.ne.s32.totalorder %s1765_s11, %s1406_s17  ;;  %s1411_s28 = sshll.u32 %s1551_s4, 4  ;;  %s1412_s28 = int_to_ptr.vmem [resolvable:$false] %s1411_s28 }
  0x68   : > { %s1413_s25 = scalar_lea.vmem %s1412_s28, 256  ;;  %p1414_p4 = scmp.lt.s32.totalorder %s1765_s11, %s1412_s28 }
  0x69   : > { %p1409_p1 = pnand %p1407_p0, %p1393_p2  ;;  %p1415_p6 = scmp.lt.s32.totalorder %s1413_s25, %s1406_s17 }
  0x6b   : > { %p1410_p9 = pneg %p1409_p1  ;;  %p1416_p10 = por %p1415_p6, %p1414_p4 }
  0x6d   : > { %p1417_p3 = pnand %p1416_p10, %p1410_p9 }
  0x6f   : > { %1420 = shalt.err (!%p1417_p3)
}
  0x70   : > { %1200 = dma.hbm_to_vmem [thread:$0]  (!%p1761_p11), %s1756_s20, 128, %s1765_s11, %s251_s19  }
  0x71   : > { %s268_s2 = sand.u32 1, %s1545_s26   ;;  %s272_s14 = scalar_lea.vmem [#allocation6], %s1747_s12 }
  0x72   : > { %s279_s8 = sshll.u32 %s272_s14, 4  ;;  %s269_s15 = scalar_lea.sflag [#allocation7], %s268_s2  ;;  %s280_s8 = int_to_ptr.vmem [resolvable:$true] %s279_s8 }
  0x73   : > { %s1421_s16 = scalar_lea.hbm %s1770_s18, 128  ;;  %s1426_s4 = scalar_lea.hbm %s1947_s1, 256 }
  0x74   : > { %p1422_p4 = scmp.ne.s32.totalorder %s1770_s18, %s1421_s16  ;;  %p1427_p5 = scmp.lt.u32.totalorder %s1770_s18, %s1947_s1 }
  0x75   : > { %p1428_p7 = scmp.lt.u32.totalorder %s1426_s4, %s1421_s16  ;;  %p1430_p0 = scmp.lt.u32.totalorder %s1421_s16, %s1770_s18 }
  0x76   : > { %p1424_p9 = pnand %p1422_p4, %p1393_p2 }
  0x77   : > { %p1429_p12 = por %p1428_p7, %p1427_p5 }
  0x78   : > { %p1425_p13 = pneg %p1424_p9 }
  0x79   : > { %p1431_p1 = por %p1430_p0, %p1429_p12 }
  0x7b   : > { %p1432_p6 = pnand %p1431_p1, %p1425_p13 }
  0x7d   : > { %1435 = shalt.err (!%p1432_p6)
}
  0x7e   : > { %s1436_s12 = scalar_lea.vmem %s280_s8, 128  ;;  %s1552_s20 = smov [#allocation6]  }
  0x7f   : > { %p1437_p10 = scmp.ne.s32.totalorder %s280_s8, %s1436_s12  ;;  %s1441_s11 = sshll.u32 %s1552_s20, 4  ;;  %s1442_s11 = int_to_ptr.vmem [resolvable:$false] %s1441_s11 }
  0x80   : > { %s1443_s19 = scalar_lea.vmem %s1442_s11, 256  ;;  %p1444_p9 = scmp.lt.s32.totalorder %s280_s8, %s1442_s11 }
  0x81   : > { %p1439_p3 = pnand %p1437_p10, %p1393_p2  ;;  %p1445_p8 = scmp.lt.s32.totalorder %s1443_s19, %s1436_s12 }
  0x83   : > { %p1440_p4 = pneg %p1439_p3  ;;  %p1446_p5 = por %p1445_p8, %p1444_p9 }
  0x85   : > { %p1447_p7 = pnand %p1446_p5, %p1440_p4 }
  0x87   : > { %1450 = shalt.err (!%p1447_p7)
}
  0x88   : > { %1203 = dma.hbm_to_vmem [thread:$0]  (!%p1761_p11), %s1770_s18, 128, %s280_s8, %s269_s15  }
  0x89   : > { %p1973_p13 = scmp.ne.s32.totalorder %s1964_s7, 0 }
  0x8a   : > { %s1821_s2 = sand.u32 (!%p1973_p13), 1, %s1529_s22   ;;  %p1974_p8 = scmp.ne.s32.totalorder (!%p1973_p13), %s1962_s29, 0 }
  0x8b   : > { %288 = sbr.rel (%p1973_p13) target bundleno = 888 (0x378), region = 44  ;;  %s1824_s14 = sshll.u32 (!%p1973_p13), %s1821_s2, 3 }
  0x8c   : > { %s291_s16 = scalar_lea.sflag (!%p1973_p13), [#allocation4], %s1821_s2  ;;  %s294_s9 = scalar_lea.vmem (!%p1973_p13), [#allocation3], %s1824_s14 }
  0x92   : > { %1504 = dma.done.wait (%p1974_p8), %s291_s16, 128  }
  0x93   : > { %1506 = vsyncadd (%p1974_p8), %s291_s16, 4294967168  ;;  %s299_s7 = sand.u32 1, %s1642_s27   ;;  %s303_s18 = scalar_lea.vmem [#allocation6], %s1824_s14 }
  0x94   : > { %s300_s13 = scalar_lea.sflag [#allocation7], %s299_s7 }
  0x95   : > { %1508 = dma.done.wait (%p1974_p8), %s300_s13, 128  }
  0x96   : > { %1510 = vsyncadd (%p1974_p8), %s300_s13, 4294967168  ;;  %p1975_p11 = scmp.eq.s32.totalorder %s1642_s27, 0 }
  0x98   : > { %1512 = dma.done.wait (%p1975_p11), [#allocation7], 8192   ;;  %p1976_p2 = pmov %p1975_p11 }
  0x9a   : > { %1514 = vsyncadd (%p1976_p2), [#allocation7], 4294959104  ;;  %p1977_p12 = pmov %p1976_p2 }
  0x9b   : > { %p1978_p0 = pmov %p1976_p2 }
  0x9c   : > { %1516 = dma.done.wait (%p1977_p12), [#allocation10], 2048  }
  0x9d   : > { %1518 = vsyncadd (%p1978_p0), [#allocation10], 4294965248  ;;  %v1553_v0 = vmov 5   ;;  %v1554_v1 = vmov 1   ;;  %v350_v2 = vld [vmem:[%s294_s9] sm:$0xff]  ;;  %v1555_v3 = vmov 6  }
  0x9e   : > { %1288 = vset.pattern.permute.xlu0 %v1553_v0  ;;  %1290 = vset.pattern.permute.xlu1 %v1554_v1  ;;  %v1556_v4 = vmov 13   ;;  %v1557_v5 = vmov 9   ;;  %v1558_v6 = vmov 14   ;;  %v1559_v7 = vmov 2   ;;  %v513_v16 = vld [vmem:[#allocation8 + $0x80] sm:$0xff]  ;;  %v514_v17 = vld [vmem:[#allocation8 + $0x88] sm:$0xff] }
  0x9f   : > { %359 = vperm.xlu1 %1290, %v350_v2   ;;  %379 = vperm.xlu0 %1288, %v350_v2   ;;  %v1560_v8 = vmov 10   ;;  %v1561_v9 = vmov 7   ;;  %v1562_v10 = vmov 11   ;;  %v1563_v11 = vmov 15   ;;  %v545_v18 = vld [vmem:[#allocation8 + $0x180] sm:$0xff]  ;;  %v546_v20 = vld [vmem:[#allocation8 + $0x188] sm:$0xff] }
  0xa0   : > { %v1564_v12 = vmov 0   ;;  %v1565_v13 = vmov 3   ;;  %v1566_v14 = vmov 4   ;;  %v1567_v15 = vmov 12   ;;  %v497_v23 = vld [vmem:[#allocation8] sm:$0xff]  ;;  %v498_v24 = vld [vmem:[#allocation8 + $0x8] sm:$0xff] }
  0xa1   : > { %v1088_v19 = vpack.c.bf16 %v514_v17, %v513_v16  ;;  %v1120_v21 = vpack.c.bf16 %v546_v20, %v545_v18  ;;  %v1568_v22 = vmov 8   ;;  %v529_v25 = vld [vmem:[#allocation8 + $0x100] sm:$0xff]  ;;  %v1090_v26 = vpack.c.bf16 %v498_v24, %v497_v23  ;;  %v530_v27 = vld [vmem:[#allocation8 + $0x108] sm:$0xff]  ;;  %v515_v28 = vld [vmem:[#allocation8 + $0x90] sm:$0xff]  ;;  %s1569_s27 = smov 32   ;;  %s1570_s29 = smov 64  }
  0xa2   : > { %v516_v29 = vld [vmem:[#allocation8 + $0x98] sm:$0xff]  ;;  %v1122_v30 = vpack.c.bf16 %v530_v27, %v529_v25  ;;  %v547_v32 = vld [vmem:[#allocation8 + $0x190] sm:$0xff]  ;;  %v517_v41 = vld [vmem:[#allocation8 + $0xa0] sm:$0xff]  ;;  %s1572_s8 = smov 96   ;;  %vm481_vm0 = vcmask 261120   ;;  %vm483_vm1 = vcmask 523264  }
  0xa3   : > { %1291 = vset.pattern.permute.xlu1 %v1555_v3  ;;  %1289 = vset.pattern.permute.xlu0 %v1556_v4  ;;  %v1092_v31 = vpack.c.bf16 %v516_v29, %v515_v28  ;;  %v548_v33 = vld [vmem:[#allocation8 + $0x198] sm:$0xff]  ;;  %v499_v35 = vld [vmem:[#allocation8 + $0x10] sm:$0xff]  ;;  %v518_v42 = vld [vmem:[#allocation8 + $0xa8] sm:$0xff]  ;;  %vm485_vm2 = vcmask 785408   ;;  %vm1573_vm3 = vmmov 0   ;;  %s963_s25 = sshll.u32 %s1537_s24, 7 }
  0xa4   : > { %384 = vperm.xlu1 %1291, %v350_v2   ;;  %419 = vperm.xlu0 %1289, %v350_v2   ;;  %v1124_v34 = vpack.c.bf16 %v548_v33, %v547_v32  ;;  %v500_v36 = vld [vmem:[#allocation8 + $0x18] sm:$0xff]  ;;  %v531_v37 = vld [vmem:[#allocation8 + $0x110] sm:$0xff]  ;;  %v549_v43 = vld [vmem:[#allocation8 + $0x1a0] sm:$0xff]  ;;  %v1096_v44 = vpack.c.bf16 %v518_v42, %v517_v41  ;;  %s344_s12 = scalar_lea.vmem [#allocation11], %s1824_s14  ;;  %s1897_s16 = scalar_lea.hbm %s1952_s6, %s963_s25 }
  0xa5   : > { %1089 = vmatprep.subr.bf16.mxu0 %v1088_v19  ;;  %1121 = vmatprep.subr.bf16.mxu1 %v1120_v21  ;;  %v1094_v38 = vpack.c.bf16 %v500_v36, %v499_v35  ;;  %v532_v39 = vld [vmem:[#allocation8 + $0x118] sm:$0xff]  ;;  %v550_v45 = vld [vmem:[#allocation8 + $0x1a8] sm:$0xff]  ;;  %v501_v47 = vld [vmem:[#allocation8 + $0x20] sm:$0xff]  ;;  %s824_s20 = sshll.u32 %s344_s12, 4  ;;  %s811_s9 = scalar_lea.sflag [#allocation5], %s1821_s2  ;;  %s1899_s20 = int_to_ptr.vmem [resolvable:$true] %s824_s20 }
  0xa6   : > { %1091 = vmatpush3.bf16.msra.mxu0 %v1090_v26  ;;  %1123 = vmatpush3.bf16.msra.mxu1 %v1122_v30  ;;  %v1126_v40 = vpack.c.bf16 %v532_v39, %v531_v37  ;;  %v1128_v46 = vpack.c.bf16 %v550_v45, %v549_v43  ;;  %v502_v48 = vld [vmem:[#allocation8 + $0x28] sm:$0xff]  ;;  %v533_v49 = vld [vmem:[#allocation8 + $0x120] sm:$0xff]  ;;  %v1848_v54 = vld [vmem:[%s303_s18] sm:$0xff]  ;;  %s1451_s7 = scalar_lea.vmem %s1899_s20, 128  ;;  %p1979_p6 = scmp.ne.s32.totalorder %s1970_s10, 0 }
  0xa7   : > { %1093 = vmatprep.subr.bf16.mxu0 %v1092_v31  ;;  %1125 = vmatprep.subr.bf16.mxu1 %v1124_v34  ;;  %v1098_v52 = vpack.c.bf16 %v502_v48, %v501_v47  ;;  %v534_v53 = vld [vmem:[#allocation8 + $0x128] sm:$0xff]  ;;  %v519_v56 = vld [vmem:[#allocation8 + $0xb0] sm:$0xff]  ;;  %v520_v57 = vld [vmem:[#allocation8 + $0xb8] sm:$0xff]  ;;  %p1452_p1 = scmp.ne.s32.totalorder %s1899_s20, %s1451_s7  ;;  %s1575_s24 = smov [#allocation11]  }
  0xa8   : > { %1292 = vset.pattern.permute.xlu1 %v1557_v5  ;;  %1293 = vset.pattern.permute.xlu0 %v1558_v6  ;;  %v1130_v55 = vpack.c.bf16 %v534_v53, %v533_v49  ;;  %v551_v58 = vld [vmem:[#allocation8 + $0x1b0] sm:$0xff]  ;;  %v1100_v59 = vpack.c.bf16 %v520_v57, %v519_v56  ;;  %v552_v60 = vld [vmem:[#allocation8 + $0x1b8] sm:$0xff]  ;;  %v537_v18 = vld [vmem:[#allocation8 + $0x140] sm:$0xff]  ;;  %s1455_s14 = sshll.u32 %s1575_s24, 4  ;;  %s1456_s14 = int_to_ptr.vmem [resolvable:$false] %s1455_s14 }
  0xa9   : > { %399 = vperm.xlu1 %1292, %v350_v2   ;;  %424 = vperm.xlu0 %1293, %v350_v2   ;;  %v503_v61 = vld [vmem:[#allocation8 + $0x30] sm:$0xff]  ;;  %v504_v62 = vld [vmem:[#allocation8 + $0x38] sm:$0xff]  ;;  %v1132_v0 = vpack.c.bf16 %v552_v60, %v551_v58  ;;  %v538_v19 = vld [vmem:[#allocation8 + $0x148] sm:$0xff]  ;;  %p1453_p10 = pnand %p1452_p1, %p1979_p6  ;;  %s1457_s13 = scalar_lea.vmem %s1456_s14, 256 }
  0xaa   : > { %1095 = vmatpush3.bf16.msra.mxu0 %v1094_v38  ;;  %1127 = vmatpush3.bf16.msra.mxu1 %v1126_v40  ;;  %v1102_v1 = vpack.c.bf16 %v504_v62, %v503_v61  ;;  %v536_v3 = vld [vmem:[#allocation8 + $0x138] sm:$0xff]  ;;  %v523_v20 = vld [vmem:[#allocation8 + $0xd0] sm:$0xff]  ;;  %v1138_v21 = vpack.c.bf16 %v538_v19, %v537_v18  ;;  %v525_v41 = vld [vmem:[#allocation8 + $0xe0] sm:$0xff]  ;;  %p1458_p4 = scmp.lt.s32.totalorder %s1899_s20, %s1456_s14  ;;  %p1459_p9 = scmp.lt.s32.totalorder %s1457_s13, %s1451_s7 }
  0xab   : > { %1097 = vmatprep.subr.bf16.mxu0 %v1096_v44  ;;  %1129 = vmatprep.subr.bf16.mxu1 %v1128_v46  ;;  %v555_v23 = vld [vmem:[#allocation8 + $0x1d0] sm:$0xff]  ;;  %v556_v24 = vld [vmem:[#allocation8 + $0x1d8] sm:$0xff]  ;;  %v526_v42 = vld [vmem:[#allocation8 + $0xe8] sm:$0xff]  ;;  %p1454_p3 = pneg %p1453_p10 }
  0xac   : > { %v1140_v29 = vpack.c.bf16 %v556_v24, %v555_v23  ;;  %v507_v30 = vld [vmem:[#allocation8 + $0x50] sm:$0xff]  ;;  %v508_v31 = vld [vmem:[#allocation8 + $0x58] sm:$0xff]  ;;  %v557_v43 = vld [vmem:[#allocation8 + $0x1e0] sm:$0xff]  ;;  %v1112_v46 = vpack.c.bf16 %v526_v42, %v525_v41  ;;  %p1460_p5 = por %p1459_p9, %p1458_p4 }
  0xad   : > { %1294 = vset.pattern.permute.xlu1 %v1559_v7  ;;  %1296 = vset.pattern.permute.xlu0 %v1560_v8  ;;  %v521_v8 = vld [vmem:[#allocation8 + $0xc0] sm:$0xff]  ;;  %v539_v32 = vld [vmem:[#allocation8 + $0x150] sm:$0xff]  ;;  %v540_v36 = vld [vmem:[#allocation8 + $0x158] sm:$0xff]  ;;  %v1110_v37 = vpack.c.bf16 %v508_v31, %v507_v30 }
  0xae   : > { %364 = vperm.xlu1 %1294, %v350_v2   ;;  %404 = vperm.xlu0 %1296, %v350_v2   ;;  %v1142_v38 = vpack.c.bf16 %v540_v36, %v539_v32  ;;  %v558_v47 = vld [vmem:[#allocation8 + $0x1e8] sm:$0xff]  ;;  %v509_v48 = vld [vmem:[#allocation8 + $0x60] sm:$0xff]  ;;  %v528_v60 = vld [vmem:[#allocation8 + $0xf8] sm:$0xff]  ;;  %p1461_p7 = pnand %p1460_p5, %p1454_p3 }
  0xaf   : > { %1099 = vmatpush3.bf16.msra.mxu0 %v1098_v52  ;;  %1131 = vmatpush3.bf16.msra.mxu1 %v1130_v55  ;;  %v510_v49 = vld [vmem:[#allocation8 + $0x68] sm:$0xff]  ;;  %v1144_v52 = vpack.c.bf16 %v558_v47, %v557_v43  ;;  %v541_v53 = vld [vmem:[#allocation8 + $0x160] sm:$0xff]  ;;  %v559_v61 = vld [vmem:[#allocation8 + $0x1f0] sm:$0xff] }
  0xb0   : > { %1101 = vmatprep.subr.bf16.mxu0 %v1100_v59  ;;  %1133 = vmatprep.subr.bf16.mxu1 %v1132_v0  ;;  %v542_v55 = vld [vmem:[#allocation8 + $0x168] sm:$0xff]  ;;  %v1114_v56 = vpack.c.bf16 %v510_v49, %v509_v48  ;;  %v527_v59 = vld [vmem:[#allocation8 + $0xf0] sm:$0xff]  ;;  %v716_v43 = vld [vmem:[#allocation9] sm:$0xff] }
  0xb1   : > { %v1146_v57 = vpack.c.bf16 %v542_v55, %v541_v53  ;;  %v1116_v62 = vpack.c.bf16 %v528_v60, %v527_v59  ;;  %v511_v0 = vld [vmem:[#allocation8 + $0x70] sm:$0xff] }
  0xb2   : > { %1295 = vset.pattern.permute.xlu1 %v1561_v9  ;;  %1299 = vset.pattern.permute.xlu0 %v1562_v10  ;;  %v522_v9 = vld [vmem:[#allocation8 + $0xc8] sm:$0xff]  ;;  %v553_v10 = vld [vmem:[#allocation8 + $0x1c0] sm:$0xff] }
  0xb3   : > { %389 = vperm.xlu1 %1295, %v350_v2   ;;  %409 = vperm.xlu0 %1299, %v350_v2  }
  0xb4   : > { %1103 = vmatpush3.bf16.msra.mxu0 %v1102_v1  ;;  %v512_v1 = vld [vmem:[#allocation8 + $0x78] sm:$0xff] }
  0xb7   : > { %1297 = vset.pattern.permute.xlu1 %v1563_v11  ;;  %1302 = vset.pattern.permute.xlu0 %v1564_v12  ;;  %v554_v12 = vld [vmem:[#allocation8 + $0x1c8] sm:$0xff] }
  0xb8   : > { %429 = vperm.xlu1 %1297, %v350_v2   ;;  %354 = vperm.xlu0 %1302, %v350_v2   ;;  %v1136_v16 = vpack.c.bf16 %v554_v12, %v553_v10  ;;  %v1571_v12 = vmov 0.0|0.0  }
  0xbc   : > { %1298 = vset.pattern.permute.xlu1 %v1565_v13  ;;  %1334 = vset.pattern.permute.xlu0 %v1563_v11  ;;  %v1104_v11 = vpack.c.bf16 %v522_v9, %v521_v8  ;;  %v505_v13 = vld [vmem:[#allocation8 + $0x40] sm:$0xff] }
  0xbd   : > { %369 = vperm.xlu1 %1298, %v350_v2  }
  0xbe   : > { %1105 = vmatprep.subr.bf16.mxu0 %v1104_v11 }
  0xc1   : > { %1300 = vset.pattern.permute.xlu1 %v1566_v14  ;;  %v506_v14 = vld [vmem:[#allocation8 + $0x48] sm:$0xff] }
  0xc2   : > { %374 = vperm.xlu1 %1300, %v350_v2   ;;  %v1106_v17 = vpack.c.bf16 %v506_v14, %v505_v13 }
  0xc4   : > { %1107 = vmatpush3.bf16.msra.mxu0 %v1106_v17 }
  0xc6   : > { %1301 = vset.pattern.permute.xlu1 %v1567_v15 }
  0xc7   : > { %414 = vperm.xlu1 %1301, %v350_v2  }
  0xcb   : > { %1303 = vset.pattern.permute.xlu1 %v1568_v22  ;;  %v524_v22 = vld [vmem:[#allocation8 + $0xd8] sm:$0xff] }
  0xcc   : > { %394 = vperm.xlu1 %1303, %v350_v2   ;;  %v535_v2 = vld [vmem:[#allocation8 + $0x130] sm:$0xff]  ;;  %v1108_v28 = vpack.c.bf16 %v524_v22, %v523_v20 }
  0xcd   : > { %v1134_v6 = vpack.c.bf16 %v536_v3, %v535_v2 }
  0xce   : > { %1109 = vmatprep.subr.bf16.mxu0 %v1108_v28 }
  0xcf   : > { %1135 = vmatpush3.bf16.msra.mxu1 %v1134_v6  ;;  %1111 = vmatpush3.bf16.msra.mxu0 %v1110_v37  ;;  %v544_v6 = vld [vmem:[#allocation8 + $0x178] sm:$0xff] }
  0xd0   : > { %1137 = vmatprep.subr.bf16.mxu1 %v1136_v16  ;;  %1113 = vmatprep.subr.bf16.mxu0 %v1112_v46 }
  0xd3   : > { %1139 = vmatpush3.bf16.msra.mxu1 %v1138_v21  ;;  %1115 = vmatpush3.bf16.msra.mxu0 %v1114_v56 }
  0xd4   : > { %1141 = vmatprep.subr.bf16.mxu1 %v1140_v29  ;;  %1117 = vmatprep.subr.bf16.mxu0 %v1116_v62  ;;  %v720_v62 = vld [vmem:[#allocation9 + $0x20] sm:$0xff] }
  0xd7   : > { %1143 = vmatpush3.bf16.msra.mxu1 %v1142_v38 }
  0xd8   : > { %1145 = vmatprep.subr.bf16.mxu1 %v1144_v52 }
  0xdb   : > { %1147 = vmatpush3.bf16.msra.mxu1 %v1146_v57  ;;  %v718_v57 = vld [vmem:[#allocation9 + $0x10] sm:$0xff] }
 0x11e   : > { %v360_v50 = vpop.permute.xlu1 %359  ;;  %v380_v51 = vpop.permute.xlu0 %379 }
 0x11f   : > { %v382_v63 = vmul.f32 %v380_v51, %v1848_v54  ;;  %v362_v25 = vmul.f32 %v360_v50, %v1848_v54 }
 0x123   : > { %v385_v4 = vpop.permute.xlu1 %384  ;;  %v420_v5 = vpop.permute.xlu0 %419 }
 0x124   : > { %v422_v7 = vmul.f32 %v420_v5, %v1848_v54  ;;  %v387_v33 = vmul.f32 %v385_v4, %v1848_v54  ;;  %v1118_v4 = vpack.c.bf16 %v512_v1, %v511_v0  ;;  %v543_v5 = vld [vmem:[#allocation8 + $0x170] sm:$0xff] }
 0x125   : > { %v722_v1 = vld [vmem:[#allocation9 + $0x30] sm:$0xff] }
 0x126   : > { %v1304_v15 = vpack.i.bf16 %v422_v7, %v382_v63  ;;  %v560_v63 = vld [vmem:[#allocation8 + $0x1f8] sm:$0xff]  ;;  %v1150_v7 = vpack.c.bf16 %v544_v6, %v543_v5  ;;  %1119 = vmatpush3.bf16.msra.mxu0 %v1118_v4  ;;  %v724_v4 = vld [vmem:[#allocation9 + $0x40] sm:$0xff]  ;;  %v725_v5 = vld [vmem:[#allocation9 + $0x48] sm:$0xff] }
 0x127   : > { %v1148_v3 = vpack.c.bf16 %v560_v63, %v559_v61  ;;  %1152 = vmatprep.subr.bf16.mxu0 %v1571_v12  ;;  %v721_v63 = vld [vmem:[#allocation9 + $0x28] sm:$0xff]  ;;  %v1165_v6 = vpack.c.bf16 %v725_v5, %v724_v4 }
 0x128   : > { %v400_v26 = vpop.permute.xlu1 %399  ;;  %v425_v27 = vpop.permute.xlu0 %424  ;;  %1305 = vrot.lane.b32.xlu1 %v1304_v15, %s1569_s27  ;;  %v1159_v0 = vpack.c.bf16 %v721_v63, %v720_v62 }
 0x129   : > { %v402_v34 = vmul.f32 %v400_v26, %v1848_v54  ;;  %v427_v35 = vmul.f32 %v425_v27, %v1848_v54  ;;  %1149 = vmatprep.subr.bf16.mxu1 %v1148_v3 }
 0x12a   : > { %1151 = vmatpush3.bf16.msra.mxu1 %v1150_v7  ;;  %v726_v7 = vld [vmem:[#allocation9 + $0x50] sm:$0xff] }
 0x12b   : > { %v1309_v39 = vpack.i.bf16 %v402_v34, %v362_v25  ;;  %v1314_v40 = vpack.i.bf16 %v427_v35, %v387_v33 }
 0x12d   : > { %v365_v44 = vpop.permute.xlu1 %364  ;;  %1310 = vrot.lane.b32.xlu0 %v1309_v39, %s1569_s27  ;;  %1315 = vrot.lane.b32.xlu1 %v1314_v40, %s1570_s29  ;;  %v405_v45 = vpop.permute.xlu0 %404 }
 0x12e   : > { %v367_v50 = vmul.f32 %v365_v44, %v1848_v54  ;;  %v407_v51 = vmul.f32 %v405_v45, %v1848_v54  ;;  %v717_v44 = vld [vmem:[#allocation9 + $0x8] sm:$0xff] }
 0x12f   : > { %v1153_v49 = vpack.c.bf16 %v717_v44, %v716_v43 }
 0x130   : > { %v1319_v58 = vpack.i.bf16 %v407_v51, %v367_v50 }
 0x132   : > { %v390_v2 = vpop.permute.xlu1 %389  ;;  %1320 = vrot.lane.b32.xlu0 %v1319_v58, %s1570_s29  ;;  %v410_v11 = vpop.permute.xlu0 %409  ;;  %v719_v58 = vld [vmem:[#allocation9 + $0x18] sm:$0xff] }
 0x133   : > { %v392_v9 = vmul.f32 %v390_v2, %v1848_v54  ;;  %v412_v14 = vmul.f32 %v410_v11, %v1848_v54  ;;  %v1156_v61 = vpack.c.bf16 %v719_v58, %v718_v57  ;;  %v723_v2 = vld [vmem:[#allocation9 + $0x38] sm:$0xff]  ;;  %v729_v11 = vld [vmem:[#allocation9 + $0x68] sm:$0xff] }
 0x134   : > { %v1162_v3 = vpack.c.bf16 %v723_v2, %v722_v1 }
 0x137   : > { %v430_v8 = vpop.permute.xlu1 %429  ;;  %v355_v21 = vpop.permute.xlu0 %354 }
 0x138   : > { %v432_v10 = vmul.f32 %v430_v8, %v1848_v54  ;;  %v357_v32 = vmul.f32 %v355_v21, %v1848_v54  ;;  %v727_v8 = vld [vmem:[#allocation9 + $0x58] sm:$0xff] }
 0x13a   : > { %v1324_v13 = vpack.i.bf16 %v432_v10, %v392_v9  ;;  %v1168_v9 = vpack.c.bf16 %v727_v8, %v726_v7  ;;  %v728_v10 = vld [vmem:[#allocation9 + $0x60] sm:$0xff] }
 0x13c   : > { %v370_v15 = vpop.permute.xlu1 %369  ;;  %1325 = vrot.lane.b32.xlu1 %v1324_v13, %s1572_s8  ;;  %v1171_v13 = vpack.c.bf16 %v729_v11, %v728_v10 }
 0x13d   : > { %v372_v16 = vmul.f32 %v370_v15, %v1848_v54  ;;  %v731_v15 = vld [vmem:[#allocation9 + $0x78] sm:$0xff] }
 0x13f   : > { %v1329_v17 = vpack.i.bf16 %v412_v14, %v372_v16  ;;  %v730_v14 = vld [vmem:[#allocation9 + $0x70] sm:$0xff] }
 0x140   : > { %v1174_v16 = vpack.c.bf16 %v731_v15, %v730_v14 }
 0x141   : > { %1330 = vrot.lane.b32.xlu0 %v1329_v17, %s1572_s8  ;;  %v375_v18 = vpop.permute.xlu1 %374  ;;  %v1574_v17 = vmov 0.0  }
 0x142   : > { %v377_v27 = vmul.f32 %v375_v18, %v1848_v54 }
 0x146   : > { %v415_v19 = vpop.permute.xlu1 %414 }
 0x147   : > { %v417_v24 = vmul.f32 %v415_v19, %v1848_v54 }
 0x14b   : > { %v395_v20 = vpop.permute.xlu1 %394 }
 0x14c   : > { %v397_v35 = vmul.f32 %v395_v20, %v1848_v54 }
 0x19a   : > { %v1306_v22 = vpop.permute.xlu1 %1305 }
 0x19b   : > { %v1308_v25 = vunpack.i.h.bf16 %v1306_v22  ;;  %v1307_v28 = vunpack.i.l.bf16 %v1306_v22 }
 0x19d   : > { %v493_v31 = vsel %vm481_vm0, %v417_v24, %v1308_v25  ;;  %v487_v38 = vsel %vm481_vm0, %v377_v27, %v1307_v28  ;;  %v961_v27 = vld [vmem:[%s1951_s5] ss:$0 sm:$0xff] }
 0x19f   : > { %v1311_v23 = vpop.permute.xlu0 %1310  ;;  %v1316_v26 = vpop.permute.xlu1 %1315 }
 0x1a0   : > { %v1318_v29 = vunpack.i.h.bf16 %v1316_v26  ;;  %v1317_v30 = vunpack.i.l.bf16 %v1316_v26  ;;  %v1313_v39 = vunpack.i.h.bf16 %v1311_v23  ;;  %v1312_v40 = vunpack.i.l.bf16 %v1311_v23 }
 0x1a2   : > { %v488_v41 = vsel %vm483_vm1, %v487_v38, %v1317_v30  ;;  %v494_v42 = vsel %vm483_vm1, %v493_v31, %v1318_v29  ;;  %v482_v52 = vsel %vm481_vm0, %v357_v32, %v1312_v40  ;;  %v490_v53 = vsel %vm481_vm0, %v397_v35, %v1313_v39 }
 0x1a4   : > { %v1321_v33 = vpop.permute.xlu0 %1320 }
 0x1a5   : > { %v1323_v45 = vunpack.i.h.bf16 %v1321_v33  ;;  %v1322_v46 = vunpack.i.l.bf16 %v1321_v33 }
 0x1a7   : > { %v484_v55 = vsel %vm483_vm1, %v482_v52, %v1322_v46  ;;  %v491_v56 = vsel %vm483_vm1, %v490_v53, %v1323_v45 }
 0x1ae   : > { %v1326_v34 = vpop.permute.xlu1 %1325 }
 0x1af   : > { %v1328_v36 = vunpack.i.h.bf16 %v1326_v34  ;;  %v1327_v37 = vunpack.i.l.bf16 %v1326_v34 }
 0x1b1   : > { %v489_v47 = vsel %vm485_vm2, %v488_v41, %v1327_v37  ;;  %v495_v48 = vsel %vm485_vm2, %v494_v42, %v1328_v36 }
 0x1b2   : > { %625 = vmatprep.mubr.f32.mxu0 %v489_v47  ;;  %695 = vmatprep.mubr.f32.mxu1 %v495_v48 }
 0x1b3   : > { %v1331_v54 = vpop.permute.xlu0 %1330 }
 0x1b4   : > { %v1333_v50 = vunpack.i.h.bf16 %v1331_v54  ;;  %v1332_v51 = vunpack.i.l.bf16 %v1331_v54 }
 0x1b6   : > { %v486_v59 = vsel %vm485_vm2, %v484_v55, %v1332_v51  ;;  %v492_v60 = vsel %vm485_vm2, %v491_v56, %v1333_v50 }
 0x1b7   : > { %626 = vmatmul.mubr.f32.vlgmr.msra.gmra.mrb[0].mxu0 %v486_v59  ;;  %696 = vmatmul.mubr.f32.vlgmr.msra.gmra.mrb[0].mxu1 %v492_v60 }
 0x1b8   : > { %1154 = vmatpush3.bf16.msra.mxu0 %v1153_v49  ;;  %1085 = vmatprep.mubr.msk.f32.mxu0 %vm1573_vm3, %v1574_v17 }
 0x1b9   : > { %1155 = vmatprep.subr.bf16.mxu0 %v1571_v12 }
 0x1bc   : > { %1157 = vmatpush3.bf16.msra.mxu0 %v1156_v61 }
 0x1bd   : > { %1158 = vmatprep.subr.bf16.mxu0 %v1571_v12 }
 0x1c0   : > { %1160 = vmatpush3.bf16.msra.mxu0 %v1159_v0 }
 0x1c1   : > { %1161 = vmatprep.subr.bf16.mxu0 %v1571_v12 }
 0x1c4   : > { %1163 = vmatpush3.bf16.msra.mxu0 %v1162_v3 }
 0x1c5   : > { %1164 = vmatprep.subr.bf16.mxu0 %v1571_v12 }
 0x1c8   : > { %1166 = vmatpush3.bf16.msra.mxu0 %v1165_v6 }
 0x1c9   : > { %1167 = vmatprep.subr.bf16.mxu0 %v1571_v12 }
 0x1cc   : > { %1169 = vmatpush3.bf16.msra.mxu0 %v1168_v9 }
 0x1cd   : > { %1170 = vmatprep.subr.bf16.mxu0 %v1571_v12 }
 0x1d0   : > { %1172 = vmatpush3.bf16.msra.mxu0 %v1171_v13 }
 0x1d1   : > { %1173 = vmatprep.subr.bf16.mxu0 %v1571_v12  ;;  %v960_v12 = vld [vmem:[%s1949_s3] ss:$0 sm:$0xff] }
 0x1d4   : > { %1175 = vmatpush3.bf16.msra.mxu0 %v1174_v16 }
 0x28a   : > { %v998_v18 = vpop.f32.mrb[0].mxu0  ;;  %v1033_v19 = vpop.f32.mrb[0].mxu1 }
 0x28b   : > { %v999_v20 = vpop.f32.mrb[1].mxu0  ;;  %v1034_v21 = vpop.f32.mrb[1].mxu1 }
 0x28c   : > { %v1000_v22 = vadd.f32 %v999_v20, %v998_v18  ;;  %v1035_v23 = vadd.f32 %v1034_v21, %v1033_v19 }
 0x28e   : > { %v698_v24 = vadd.f32 %v1035_v23, %v1000_v22 }
 0x290   : > { %v714_v25 = vadd.f32 %v960_v12, %v698_v24 }
 0x292   : > { %v715_v26 = vmax.f32 %v714_v25, 0.0 }
 0x294   : > { %1086 = vmatmul.mubr.f32.vlgmr.msra.gmra.mrb[2].mxu0 %v715_v26 }
 0x367   : > { %v805_v28 = vpop.f32.mrb[2].mxu0 }
 0x368   : > { %v806_v29 = vadd.f32 %v961_v27, %v805_v28  ;;  %v1087_v30 = vpop.f32.mrb[3].mxu0 }
 0x36a   : > { %809 = vst [vmem:[%s344_s12] sm:$0xff] %v806_v29 }
 0x36b   : > { %1464 = shalt.err (!%p1461_p7)
}
 0x36c   : > { %s1465_s2 = scalar_lea.hbm %s1897_s16, 128  ;;  %s1469_s29 = scalar_lea.hbm %s1952_s6, 256 }
 0x36d   : > { %p1466_p13 = scmp.ne.s32.totalorder %s1897_s16, %s1465_s2  ;;  %p1470_p2 = scmp.lt.u32.totalorder %s1897_s16, %s1952_s6 }
 0x36e   : > { %p1471_p12 = scmp.lt.u32.totalorder %s1469_s29, %s1465_s2  ;;  %p1473_p1 = scmp.lt.u32.totalorder %s1465_s2, %s1897_s16 }
 0x36f   : > { %p1467_p8 = pnand %p1466_p13, %p1979_p6 }
 0x370   : > { %p1472_p0 = por %p1471_p12, %p1470_p2 }
 0x371   : > { %p1468_p11 = pneg %p1467_p8 }
 0x372   : > { %p1474_p10 = por %p1473_p1, %p1472_p0 }
 0x374   : > { %p1475_p3 = pnand %p1474_p10, %p1468_p11 }
 0x376   : > { %1478 = shalt.err (!%p1475_p3)
}
 0x377   : > { %1188 = dma.vmem_to_hbm [thread:$0]  (%p1979_p6), %s1899_s20, 128, %s1897_s16, %s811_s9  }
 0x378 PF: > { %s836_s17 = sand.u32 1, %s1525_s21   ;;  %p1980_p4 = scmp.ne.s32.totalorder %s1963_s30, 0 }
 0x379   : > { %p1981_p9 = scmp.ge.s32.totalorder %s1545_s26, 2  ;;  %s837_s4 = scalar_lea.sflag [#allocation5], %s836_s17 }
 0x37b   : > { %p1205_p5 = pnand %p1981_p9, %p1980_p4 }
 0x37d   : > { %1520 = dma.done.wait (!%p1205_p5), %s837_s4, 128  }
 0x37e   : > { %1522 = vsyncadd (!%p1205_p5), %s837_s4, 4294967168  ;;  %s26_s26 = sadd.s32 1, %s1545_s26   ;;  %s1982_s10 = sld [smem:[#allocation19_spill]] }
 0x37f   : > { %p23_p7 = scmp.ge.s32.totalorder %s26_s26, 4   ;;  %s1983_s24 = sld [smem:[#allocation17_spill]] }
 0x380   : > { %s1984_s25 = sld [smem:[#allocation18_spill]]  ;;  %s1985_s21 = smov %s1529_s22 }
 0x381   : > { %s1986_s22 = smov %s1533_s23  ;;  %25 = sbr.rel (!%p23_p7) target bundleno = 12 (0xc), region = 118 }
 0x384   : > { %s1987_s23 = smov %s1982_s10 }
 0x388   :  { %842 = vsyncpa [#allocation4], 1 }
 0x389   :  { %844 = vsyncpa [#allocation4 + $0x1], 1 }
 0x38a   :  { %845 = vsyncpa [#allocation7], 1 }
 0x38b   :  { %847 = vsyncpa [#allocation7 + $0x1], 1 }
 0x38c   :  { %848 = vsyncpa [#allocation10], 1 }
 0x38d   :  { %849 = vsyncpa [#allocation5], 1 }
 0x38e   :  { %851 = vsyncpa [#allocation5 + $0x1], 1 }

</bundles_post_ra>
